<compile_context>
chip_gen: v5e
topology: v5e:2x2
jax: 0.10.0
libtpu: 0.0.40
codegen_flags: <defaults>
</compile_context>

<pallas_src>
import numpy as np
import jax
import jax.numpy as jnp
from jax.experimental import pallas as pl
from jax.experimental.pallas import tpu as pltpu

_LANE = 128   # TPU lane width (last dim alignment)
_SUBLANE = 8  # TPU sublane width (second-to-last dim alignment)


def _round_up(n: int, m: int) -> int:
    return ((n + m - 1) // m) * m


def _build_etf_classifier(key, n_features: int, n_classes: int) -> jnp.ndarray:
    """Deterministically construct the ETF classifier matrix E (n_features, n_classes)."""
    if n_features < n_classes:
        raise ValueError(
            "Number of features must be greater than or equal to the number of classes"
        )
    # torch.svd(randn(n_features, n_classes)) -> U of shape (n_features, n_classes)
    A = jax.random.normal(key, (n_features, n_classes), dtype=jnp.float32)
    U, _, _ = jnp.linalg.svd(A, full_matrices=False)  # U: (n_features, n_classes)
    K = n_classes
    identity_K = jnp.eye(K, dtype=jnp.float32)
    ones_K = jnp.ones((K, K), dtype=jnp.float32)
    E = np.sqrt(K / (K - 1)) * (U @ (identity_K - (1.0 / K) * ones_K))
    return E.astype(jnp.float32)


def _etf_matmul_kernel(x_ref, w_ref, o_ref):
    # Hot path: (TM, Fp) @ (Fp, Cp) on the MXU, f32 accumulation.
    o_ref[...] = jnp.dot(
        x_ref[...], w_ref[...], preferred_element_type=jnp.float32
    ).astype(o_ref.dtype)


def etf_classifier_forward(
    x: jnp.ndarray, classifier: jnp.ndarray, *, tm: int = 512
) -> jnp.ndarray:
    """y = x @ classifier via a Pallas TPU kernel.

    Pads the class (lane) and feature (contraction) dims to multiples of 128
    and tiles the batch dimension; padding with zeros leaves the result for the
    original rows/columns unchanged, and the wrapper slices them back out.
    """
    B, F = x.shape
    F2, C = classifier.shape
    assert F == F2, f"feature mismatch: {F} vs {F2}"

    # Padded, hardware-aligned shapes.
    Fp = _round_up(max(F, _LANE), _LANE)
    Cp = _round_up(max(C, _LANE), _LANE)

    # Batch tile: multiple of 8 sublanes, capped at `tm` (512 works across
    # v5e/v6e/v7x — per-block f32 footprint is well under the scoped VMEM
    # default even with double buffering).
    TM = min(tm, _round_up(B, _SUBLANE))
    TM = _round_up(TM, _SUBLANE)
    Bp = _round_up(B, TM)

    # One-time zero padding outside the kernel (E is fixed; x padding is cheap
    # relative to the DMA it already incurs).
    xp = jnp.pad(x, ((0, Bp - B), (0, Fp - F)))
    wp = jnp.pad(classifier, ((0, Fp - F), (0, Cp - C)))

    grid = (Bp // TM,)

    out = pl.pallas_call(
        _etf_matmul_kernel,
        out_shape=jax.ShapeDtypeStruct((Bp, Cp), x.dtype),
        grid=grid,
        in_specs=[
            pl.BlockSpec((TM, Fp), lambda i: (i, 0)),   # x: tiled over batch
            pl.BlockSpec((Fp, Cp), lambda i: (0, 0)),   # E: resident across grid
        ],
        out_specs=pl.BlockSpec((TM, Cp), lambda i: (i, 0)),
        compiler_params=pltpu.CompilerParams(
            # Batch axis is independent across iterations -> shardable across
            # the two TensorCores on v7x; harmless on single-TC v5e/v6e.
            dimension_semantics=("parallel",),
        ),
    )(xp, wp)

    # Strip the padding back off.
    return out[:B, :C]


if __name__ == "__main__":
    key = jax.random.PRNGKey(0)
    k_w, k_x = jax.random.split(key)

    n_features = 32
    n_classes = 8
    batch = 8

    classifier = _build_etf_classifier(k_w, n_features, n_classes)
    x = jax.random.normal(k_x, (batch, n_features), dtype=jnp.float32)

    y = etf_classifier_forward(x, classifier)
    y = jax.block_until_ready(y)

    # Reference check against plain JAX matmul.
    y_ref = x @ classifier
    np.testing.assert_allclose(np.asarray(y), np.asarray(y_ref), rtol=1e-5, atol=1e-5)

    print("KERNEL_OK")
</pallas_src>

<mosaic_0001>
module attributes {stable_mosaic.version = 11 : i64} {
  func.func @_etf_matmul_kernel(%arg0: i32, %arg1: memref<8x128xf32, #tpu.memory_space<vmem>>, %arg2: memref<128x128xf32, #tpu.memory_space<vmem>>, %arg3: memref<8x128xf32, #tpu.memory_space<vmem>>) attributes {dimension_semantics = [#tpu.dimension_semantics<parallel>], iteration_bounds = array<i64: 1>, scalar_prefetch = 0 : i64, scratch_operands = 0 : i64, tpu.core_type = #tpu.core_type<tc>, window_params = [{transform_indices = @transform_0, window_bounds = array<i64: 8, 128>}, {pipeline_mode = #tpu.pipeline_mode<synchronous>, transform_indices = @transform_1, window_bounds = array<i64: 128, 128>}, {transform_indices = @transform_2, window_bounds = array<i64: 8, 128>}]} {
    %c0 = arith.constant 0 : index
    %c0_0 = arith.constant 0 : index
    %0 = vector.load %arg1[%c0, %c0_0] : memref<8x128xf32, #tpu.memory_space<vmem>>, vector<8x128xf32>
    %c0_1 = arith.constant 0 : index
    %c0_2 = arith.constant 0 : index
    %1 = vector.load %arg2[%c0_1, %c0_2] : memref<128x128xf32, #tpu.memory_space<vmem>>, vector<128x128xf32>
    %cst = arith.constant dense<0.000000e+00> : vector<8x128xf32>
    %2 = tpu.matmul %0, %1, %cst {dimension_numbers = #tpu.dot_dimension_numbers<[1], [0], [0], [1], [0, 0, 1, 1], [], []>} : vector<8x128xf32>, vector<128x128xf32>, vector<8x128xf32> -> vector<8x128xf32>
    %c0_3 = arith.constant 0 : index
    %c0_4 = arith.constant 0 : index
    %3 = vector.load %arg3[%c0_3, %c0_4] : memref<8x128xf32, #tpu.memory_space<vmem>>, vector<8x128xf32>
    tpu.vector_store %arg3[%c0_3, %c0_4], %2 {strides = array<i32>} : memref<8x128xf32, #tpu.memory_space<vmem>>, vector<8x128xf32>,
    return
  }
  func.func @transform_0(%arg0: i32) -> (i32, i32) {
    %c0_i32 = arith.constant 0 : i32
    %c0_i32_0 = arith.constant 0 : i32
    return %arg0, %c0_i32 : i32, i32
  }
  func.func @transform_1(%arg0: i32) -> (i32, i32) {
    %c0_i32 = arith.constant 0 : i32
    %c0_i32_0 = arith.constant 0 : i32
    %c0_i32_1 = arith.constant 0 : i32
    return %c0_i32, %c0_i32_0 : i32, i32
  }
  func.func @transform_2(%arg0: i32) -> (i32, i32) {
    %c0_i32 = arith.constant 0 : i32
    %c0_i32_0 = arith.constant 0 : i32
    return %arg0, %c0_i32 : i32, i32
  }
}

</mosaic_0001>

<bundles_post_ra>
// kernel: tpu_custom_call.1
= control target key start
LH: loop header
LB: loop body
LE: loop exit
PB: predicated region body
PF: predicated region fallthrough
CT: control target
= control target key end

     0   :  { %7 = vsyncpa [#allocation3], 0  ;;  %s210_s0 = inlined_call_operand.hbm [shape: f32[8,128], index: 0, kind: input, shape index: {}]   ;;  %s211_s1 = inlined_call_operand.hbm [shape: f32[128,128], index: 1, kind: input, shape index: {}]   ;;  %s212_s2 = inlined_call_operand.hbm [shape: f32[8,128], index: 2, kind: output, shape index: {}]  }
   0x1   :  { %8 = vsyncpa [#allocation6], 0 }
   0x2   :  { %9 = vsyncpa [#allocation4], 0  ;;  %s15_s11 = sshll.u32 %s210_s0, 4  ;;  %s181_s12 = smov [#allocation2]   ;;  %s16_s11 = int_to_ptr.hbm [resolvable:$true] %s15_s11 }
   0x3   :  { %s17_s13 = sshll.u32 %s181_s12, 4  ;;  %s25_s16 = sshll.u32 %s211_s1, 4  ;;  %s18_s13 = int_to_ptr.vmem [resolvable:$true] %s17_s13  ;;  %s26_s16 = int_to_ptr.hbm [resolvable:$true] %s25_s16 }
   0x4   :  { %20 = dma.hbm_to_vmem [thread:$0]  %s16_s11, 128, %s18_s13, [#allocation3]  }
   0x5   :  { %s182_s17 = smov [#allocation5]   ;;  %s183_s19 = smov 128  }
   0x6   :  { %s27_s18 = sshll.u32 %s182_s17, 4  ;;  %s184_s20 = smov 8   ;;  %s28_s18 = int_to_ptr.vmem [resolvable:$true] %s27_s18 }
   0x7   :  { %33 = dma.hbm_to_vmem [thread:$0]  %s26_s16, 2048, %s28_s18, [#allocation6], %s183_s19, %s183_s19, %s184_s20  }
   0x8   :  { %175 = dma.done.wait [#allocation3], 128  }
   0x9   :  { %176 = vsyncadd [#allocation3], 4294967168 }
   0xa   :  { %177 = dma.done.wait [#allocation6], 2048  }
   0xb   :  { %178 = vsyncadd [#allocation6], 4294965248  ;;  %v58_v0 = vld [vmem:[#allocation5 + $0x78] sm:$0xff]  ;;  %v57_v1 = vld [vmem:[#allocation5 + $0x70] sm:$0xff]  ;;  %s185_s0 = smov [#allocation7]   ;;  %s87_s23 = sshll.u32 %s212_s2, 4  ;;  %s88_s23 = int_to_ptr.hbm [resolvable:$true] %s87_s23 }
   0xc   :  { %59 = vmatpush.msra.mxu0 %v58_v0  ;;  %v56_v2 = vld [vmem:[#allocation5 + $0x68] sm:$0xff]  ;;  %v55_v3 = vld [vmem:[#allocation5 + $0x60] sm:$0xff]  ;;  %v54_v4 = vld [vmem:[#allocation5 + $0x58] sm:$0xff]  ;;  %s85_s1 = sshll.u32 %s185_s0, 4  ;;  %s86_s1 = int_to_ptr.vmem [resolvable:$true] %s85_s1 }
   0xd   :  { %v53_v5 = vld [vmem:[#allocation5 + $0x50] sm:$0xff]  ;;  %v52_v6 = vld [vmem:[#allocation5 + $0x48] sm:$0xff]  ;;  %v51_v7 = vld [vmem:[#allocation5 + $0x40] sm:$0xff] }
   0xe   :  { %60 = vmatpush.msra.mxu0 %v57_v1  ;;  %v50_v8 = vld [vmem:[#allocation5 + $0x38] sm:$0xff]  ;;  %v49_v9 = vld [vmem:[#allocation5 + $0x30] sm:$0xff]  ;;  %v48_v10 = vld [vmem:[#allocation5 + $0x28] sm:$0xff] }
   0xf   :  { %v47_v11 = vld [vmem:[#allocation5 + $0x20] sm:$0xff]  ;;  %v46_v12 = vld [vmem:[#allocation5 + $0x18] sm:$0xff]  ;;  %v45_v13 = vld [vmem:[#allocation5 + $0x10] sm:$0xff] }
  0x10   :  { %61 = vmatpush.msra.mxu0 %v56_v2  ;;  %v44_v14 = vld [vmem:[#allocation5 + $0x8] sm:$0xff]  ;;  %v43_v15 = vld [vmem:[#allocation5] sm:$0xff]  ;;  %v42_v16 = vld [vmem:[#allocation2] sm:$0xff] }
  0x12   :  { %62 = vmatpush.msra.mxu0 %v55_v3 }
  0x14   :  { %63 = vmatpush.msra.mxu0 %v54_v4 }
  0x16   :  { %64 = vmatpush.msra.mxu0 %v53_v5 }
  0x18   :  { %65 = vmatpush.msra.mxu0 %v52_v6 }
  0x1a   :  { %66 = vmatpush.msra.mxu0 %v51_v7 }
  0x1c   :  { %67 = vmatpush.msra.mxu0 %v50_v8 }
  0x1e   :  { %68 = vmatpush.msra.mxu0 %v49_v9 }
  0x20   :  { %69 = vmatpush.msra.mxu0 %v48_v10 }
  0x22   :  { %70 = vmatpush.msra.mxu0 %v47_v11 }
  0x24   :  { %71 = vmatpush.msra.mxu0 %v46_v12 }
  0x26   :  { %72 = vmatpush.msra.mxu0 %v45_v13 }
  0x28   :  { %73 = vmatpush.msra.mxu0 %v44_v14 }
  0x2a   :  { %74 = vmatpush.msra.mxu0 %v43_v15 }
  0x2b   :  { %75 = vmatmul.f32.vlgmr.msra.gmra.mxu0 %v42_v16 }
  0xa8   :  { %v76_v17 = vpop.f32.mrf.mxu0 }
  0xa9   :  { %79 = vst [vmem:[#allocation7] sm:$0xff] %v76_v17 }
  0xaa   :  { %90 = dma.vmem_to_hbm [thread:$0]  %s86_s1, 128, %s88_s23, [#allocation4]  }
  0xab   :  { %179 = dma.done.wait [#allocation4], 128  }
  0xac   :  { %180 = vsyncadd [#allocation4], 4294967168 }
  0xad   :  { %95 = vsyncpa [#allocation3], 1 }
  0xae   :  { %96 = vsyncpa [#allocation6], 1 }
  0xaf   :  { %97 = vsyncpa [#allocation4], 1 }

</bundles_post_ra>
